<compile_context>
chip_gen: v7x
topology: tpu7x:2x2x1
jax: 0.10.0
libtpu: 0.0.40
codegen_flags: <defaults>
</compile_context>

<pallas_src>
import functools

import jax
import jax.numpy as jnp
from jax.experimental import pallas as pl
from jax.experimental.pallas import tpu as pltpu


def _antideriv_tanh(z):
    a = jnp.abs(z)
    return a + jnp.log1p(jnp.exp(-2.0 * a))


def _round_up(x, k):
    return (x + k - 1) // k * k


def _resnn_kernel(x_ref, w0_ref, b0_ref, w1_ref, b1_ref, o_ref, *,
                  n_hidden, matmul_dtype):
    """One batch tile of the full ResNN forward.

    x_ref : (TILE_N, d+1)   f32   streamed over the batch grid axis
    w0_ref: (d+1,  m_pad)   matmul_dtype   resident
    b0_ref: (1,    m_pad)   f32            resident
    w1_ref: (m_pad, m_pad)  matmul_dtype   resident (shared by all res layers)
    b1_ref: (1,    m_pad)   f32            resident
    o_ref : (TILE_N, m_pad) f32
    """
    x = x_ref[...].astype(matmul_dtype)

    # opening layer + activation (MXU in matmul_dtype, accumulate f32)
    z = jnp.dot(x, w0_ref[...], preferred_element_type=jnp.float32) + b0_ref[...]
    h = _antideriv_tanh(z)                      # f32

    w1 = w1_ref[...]                            # loaded once, reused every step
    b1 = b1_ref[...]
    step = 1.0 / float(n_hidden)                # h-step = 1 / (nTh - 1)

    # residual layers (static unroll; nTh is small). Layers share weights.
    for _ in range(n_hidden):
        z = jnp.dot(h.astype(matmul_dtype), w1,
                    preferred_element_type=jnp.float32) + b1
        h = h + step * _antideriv_tanh(z)

    o_ref[...] = h.astype(o_ref.dtype)          # lane-dense (m_pad % 128 == 0)


def resnn_forward(x, w0, b0, w1, b1, nTh, *, tile_n=512,
                  matmul_dtype=jnp.bfloat16, interpret=False):
    """ResNN forward: x (N, d+1) f32 -> (N, m) f32.

    w0: (d+1, m) opening weight (pre-transposed, y = x @ w0 + b0)
    b0: (1, m) or (m,)
    w1: (m, m)   hidden weight shared by layers 1..nTh-1 (pre-transposed)
    b1: (1, m) or (m,)
    """
    assert nTh >= 2
    n_hidden = nTh - 1
    N, d1 = x.shape
    m = w0.shape[1]

    # ---- lane-dense feature padding: m -> multiple of 128 -------------------
    m_pad = _round_up(m, 128)
    w0_p = jnp.zeros((d1, m_pad), jnp.float32).at[:, :m].set(w0)
    b0_p = jnp.zeros((1, m_pad), jnp.float32).at[:, :m].set(jnp.reshape(b0, (1, m)))
    w1_p = jnp.zeros((m_pad, m_pad), jnp.float32).at[:m, :m].set(w1)  # zero pad rows/cols
    b1_p = jnp.zeros((1, m_pad), jnp.float32).at[:, :m].set(jnp.reshape(b1, (1, m)))

    # cast weights once for the MXU; biases / accumulation / activations stay f32
    w0_p = w0_p.astype(matmul_dtype)
    w1_p = w1_p.astype(matmul_dtype)

    # ---- batch tiling (8-aligned row tiles, padded N) ------------------------
    tile_n = max(8, min(int(tile_n), _round_up(N, 8)))
    n_pad = _round_up(N, tile_n)
    if n_pad != N:
        x = jnp.zeros((n_pad, d1), x.dtype).at[:N].set(x)
    grid = (n_pad // tile_n,)

    # ---- explicit VMEM budget: 2x double-buffered tiles + resident weights ---
    bytes_tiles = 2 * tile_n * d1 * 4 + 2 * tile_n * m_pad * 4
    bytes_weights = (w0_p.size * w0_p.dtype.itemsize +
                     w1_p.size * w1_p.dtype.itemsize +
                     b0_p.size * 4 + b1_p.size * 4)
    vmem_limit = max(16 << 20, min(bytes_tiles + bytes_weights + (8 << 20), 64 << 20))

    kernel = functools.partial(_resnn_kernel, n_hidden=n_hidden,
                               matmul_dtype=matmul_dtype)

    out = pl.pallas_call(
        kernel,
        grid=grid,
        in_specs=[
            pl.BlockSpec((tile_n, d1), lambda i: (i, 0)),       # x: streamed
            pl.BlockSpec((d1, m_pad), lambda i: (0, 0)),        # w0: resident
            pl.BlockSpec((1, m_pad), lambda i: (0, 0)),         # b0: resident
            pl.BlockSpec((m_pad, m_pad), lambda i: (0, 0)),     # w1: resident
            pl.BlockSpec((1, m_pad), lambda i: (0, 0)),         # b1: resident
        ],
        out_specs=pl.BlockSpec((tile_n, m_pad), lambda i: (i, 0)),
        out_shape=jax.ShapeDtypeStruct((n_pad, m_pad), jnp.float32),
        compiler_params=pltpu.CompilerParams(
            dimension_semantics=("parallel",),   # megacore shard on v7x
            vmem_limit_bytes=int(vmem_limit),
        ),
        interpret=interpret,
    )(x, w0_p, b0_p, w1_p, b1_p)

    return out[:N, :m]


def _resnn_reference(x, w0, b0, w1, b1, nTh):
    """Pure-JAX f32 reference matching the torch module."""
    h = _antideriv_tanh(x @ w0 + b0)
    step = 1.0 / (nTh - 1)
    for _ in range(nTh - 1):
        h = h + step * _antideriv_tanh(h @ w1 + b1)
    return h


if __name__ == "__main__":
    # small shapes consistent with the module: d=4 -> input dim d+1=5, m=32, nTh=3
    d, m, nTh = 4, 32, 3
    nex = 16

    key = jax.random.PRNGKey(0)
    kx, kw0, kb0, kw1, kb1 = jax.random.split(key, 5)

    x = jax.random.normal(kx, (nex, d + 1), dtype=jnp.float32)

    # deterministic synthetic parameters (shapes follow nn.Linear in __init__);
    # weights stored PRE-TRANSPOSED as (in_features, out_features).
    w0 = jax.random.normal(kw0, (d + 1, m), dtype=jnp.float32) * 0.2
    b0 = jax.random.normal(kb0, (1, m), dtype=jnp.float32) * 0.1
    # layer 1: Linear(m, m); layers 2..nTh-1 are deepcopies -> single shared weight
    w1 = jax.random.normal(kw1, (m, m), dtype=jnp.float32) * 0.1
    b1 = jax.random.normal(kb1, (1, m), dtype=jnp.float32) * 0.1

    ref = _resnn_reference(x, w0, b0, w1, b1, nTh)

    # exactness check with f32 MXU inputs
    out_f32 = jax.block_until_ready(
        resnn_forward(x, w0, b0, w1, b1, nTh, matmul_dtype=jnp.float32))
    assert out_f32.shape == (nex, m)
    assert jnp.allclose(out_f32, ref, atol=1e-5, rtol=1e-5)

    # fast path: bf16 MXU inputs, f32 accumulation / activations
    out_bf16 = jax.block_until_ready(
        resnn_forward(x, w0, b0, w1, b1, nTh, matmul_dtype=jnp.bfloat16))
    assert out_bf16.shape == (nex, m)
    assert jnp.allclose(out_bf16, ref, atol=3e-2, rtol=3e-2)

    print("KERNEL_OK")
</pallas_src>

<mosaic_0001>
module attributes {stable_mosaic.version = 11 : i64} {
  func.func @_resnn_kernel(%arg0: i32, %arg1: memref<16x5xf32, #tpu.memory_space<vmem>>, %arg2: memref<5x128xf32, #tpu.memory_space<vmem>>, %arg3: memref<1x128xf32, #tpu.memory_space<vmem>>, %arg4: memref<128x128xf32, #tpu.memory_space<vmem>>, %arg5: memref<1x128xf32, #tpu.memory_space<vmem>>, %arg6: memref<16x128xf32, #tpu.memory_space<vmem>>) attributes {dimension_semantics = [#tpu.dimension_semantics<parallel>], iteration_bounds = array<i64: 1>, scalar_prefetch = 0 : i64, scratch_operands = 0 : i64, tpu.core_type = #tpu.core_type<tc>, window_params = [{transform_indices = @transform_0, window_bounds = array<i64: 16, 5>}, {pipeline_mode = #tpu.pipeline_mode<synchronous>, transform_indices = @transform_1, window_bounds = array<i64: 5, 128>}, {pipeline_mode = #tpu.pipeline_mode<synchronous>, transform_indices = @transform_2, window_bounds = array<i64: 1, 128>}, {pipeline_mode = #tpu.pipeline_mode<synchronous>, transform_indices = @transform_3, window_bounds = array<i64: 128, 128>}, {pipeline_mode = #tpu.pipeline_mode<synchronous>, transform_indices = @transform_4, window_bounds = array<i64: 1, 128>}, {transform_indices = @transform_5, window_bounds = array<i64: 16, 128>}]} {
    %c0 = arith.constant 0 : index
    %c0_0 = arith.constant 0 : index
    %0 = vector.load %arg1[%c0, %c0_0] : memref<16x5xf32, #tpu.memory_space<vmem>>, vector<16x5xf32>
    %c0_1 = arith.constant 0 : index
    %c0_2 = arith.constant 0 : index
    %1 = vector.load %arg2[%c0_1, %c0_2] : memref<5x128xf32, #tpu.memory_space<vmem>>, vector<5x128xf32>
    %cst = arith.constant dense<0.000000e+00> : vector<16x128xf32>
    %2 = tpu.matmul %0, %1, %cst {dimension_numbers = #tpu.dot_dimension_numbers<[1], [0], [0], [1], [0, 0, 1, 1], [], []>} : vector<16x5xf32>, vector<5x128xf32>, vector<16x128xf32> -> vector<16x128xf32>
    %c0_3 = arith.constant 0 : index
    %c0_4 = arith.constant 0 : index
    %3 = vector.load %arg3[%c0_3, %c0_4] : memref<1x128xf32, #tpu.memory_space<vmem>>, vector<1x128xf32>
    %4 = vector.broadcast %3 : vector<1x128xf32> to vector<16x128xf32>
    %5 = arith.addf %2, %4 : vector<16x128xf32>
    %6 = math.absf %5 : vector<16x128xf32>
    %cst_5 = arith.constant -2.000000e+00 : f32
    %7 = vector.broadcast %cst_5 : f32 to vector<16x128xf32>
    %8 = arith.mulf %7, %6 : vector<16x128xf32>
    %9 = math.exp %8 : vector<16x128xf32>
    %10 = math.log1p %9 : vector<16x128xf32>
    %11 = arith.addf %6, %10 : vector<16x128xf32>
    %c0_6 = arith.constant 0 : index
    %c0_7 = arith.constant 0 : index
    %12 = vector.load %arg4[%c0_6, %c0_7] : memref<128x128xf32, #tpu.memory_space<vmem>>, vector<128x128xf32>
    %c0_8 = arith.constant 0 : index
    %c0_9 = arith.constant 0 : index
    %13 = vector.load %arg5[%c0_8, %c0_9] : memref<1x128xf32, #tpu.memory_space<vmem>>, vector<1x128xf32>
    %cst_10 = arith.constant dense<0.000000e+00> : vector<16x128xf32>
    %14 = tpu.matmul %11, %12, %cst_10 {dimension_numbers = #tpu.dot_dimension_numbers<[1], [0], [0], [1], [0, 0, 1, 1], [], []>} : vector<16x128xf32>, vector<128x128xf32>, vector<16x128xf32> -> vector<16x128xf32>
    %15 = vector.broadcast %13 : vector<1x128xf32> to vector<16x128xf32>
    %16 = arith.addf %14, %15 : vector<16x128xf32>
    %17 = math.absf %16 : vector<16x128xf32>
    %cst_11 = arith.constant -2.000000e+00 : f32
    %18 = vector.broadcast %cst_11 : f32 to vector<16x128xf32>
    %19 = arith.mulf %18, %17 : vector<16x128xf32>
    %20 = math.exp %19 : vector<16x128xf32>
    %21 = math.log1p %20 : vector<16x128xf32>
    %22 = arith.addf %17, %21 : vector<16x128xf32>
    %cst_12 = arith.constant 5.000000e-01 : f32
    %23 = vector.broadcast %cst_12 : f32 to vector<16x128xf32>
    %24 = arith.mulf %23, %22 : vector<16x128xf32>
    %25 = arith.addf %11, %24 : vector<16x128xf32>
    %cst_13 = arith.constant dense<0.000000e+00> : vector<16x128xf32>
    %26 = tpu.matmul %25, %12, %cst_13 {dimension_numbers = #tpu.dot_dimension_numbers<[1], [0], [0], [1], [0, 0, 1, 1], [], []>} : vector<16x128xf32>, vector<128x128xf32>, vector<16x128xf32> -> vector<16x128xf32>
    %27 = vector.broadcast %13 : vector<1x128xf32> to vector<16x128xf32>
    %28 = arith.addf %26, %27 : vector<16x128xf32>
    %29 = math.absf %28 : vector<16x128xf32>
    %cst_14 = arith.constant -2.000000e+00 : f32
    %30 = vector.broadcast %cst_14 : f32 to vector<16x128xf32>
    %31 = arith.mulf %30, %29 : vector<16x128xf32>
    %32 = math.exp %31 : vector<16x128xf32>
    %33 = math.log1p %32 : vector<16x128xf32>
    %34 = arith.addf %29, %33 : vector<16x128xf32>
    %cst_15 = arith.constant 5.000000e-01 : f32
    %35 = vector.broadcast %cst_15 : f32 to vector<16x128xf32>
    %36 = arith.mulf %35, %34 : vector<16x128xf32>
    %37 = arith.addf %25, %36 : vector<16x128xf32>
    %c0_16 = arith.constant 0 : index
    %c0_17 = arith.constant 0 : index
    %38 = vector.load %arg6[%c0_16, %c0_17] : memref<16x128xf32, #tpu.memory_space<vmem>>, vector<16x128xf32>
    tpu.vector_store %arg6[%c0_16, %c0_17], %37 {strides = array<i32>} : memref<16x128xf32, #tpu.memory_space<vmem>>, vector<16x128xf32>,
    return
  }
  func.func @transform_0(%arg0: i32) -> (i32, i32) {
    %c0_i32 = arith.constant 0 : i32
    %c0_i32_0 = arith.constant 0 : i32
    return %arg0, %c0_i32 : i32, i32
  }
  func.func @transform_1(%arg0: i32) -> (i32, i32) {
    %c0_i32 = arith.constant 0 : i32
    %c0_i32_0 = arith.constant 0 : i32
    %c0_i32_1 = arith.constant 0 : i32
    return %c0_i32, %c0_i32_0 : i32, i32
  }
  func.func @transform_2(%arg0: i32) -> (i32, i32) {
    %c0_i32 = arith.constant 0 : i32
    %c0_i32_0 = arith.constant 0 : i32
    %c0_i32_1 = arith.constant 0 : i32
    return %c0_i32, %c0_i32_0 : i32, i32
  }
  func.func @transform_3(%arg0: i32) -> (i32, i32) {
    %c0_i32 = arith.constant 0 : i32
    %c0_i32_0 = arith.constant 0 : i32
    %c0_i32_1 = arith.constant 0 : i32
    return %c0_i32, %c0_i32_0 : i32, i32
  }
  func.func @transform_4(%arg0: i32) -> (i32, i32) {
    %c0_i32 = arith.constant 0 : i32
    %c0_i32_0 = arith.constant 0 : i32
    %c0_i32_1 = arith.constant 0 : i32
    return %c0_i32, %c0_i32_0 : i32, i32
  }
  func.func @transform_5(%arg0: i32) -> (i32, i32) {
    %c0_i32 = arith.constant 0 : i32
    %c0_i32_0 = arith.constant 0 : i32
    return %arg0, %c0_i32 : i32, i32
  }
}

</mosaic_0001>

<bundles_post_ra>
// kernel: tpu_custom_call.1
= control target key start
LH: loop header
LB: loop body
LE: loop exit
PB: predicated region body
PF: predicated region fallthrough
CT: control target
= control target key end

     0   :  { %10 = vsyncpa [#allocation3], 0  ;;  %s753_s0 = inlined_call_operand.vmem [shape: f32[16,5], index: 0, kind: input, shape index: {}]   ;;  %s754_s1 = inlined_call_operand.vmem [shape: f32[5,128], index: 1, kind: input, shape index: {}]   ;;  %s755_s2 = inlined_call_operand.vmem [shape: f32[1,128], index: 2, kind: input, shape index: {}]   ;;  %s756_s3 = inlined_call_operand.hbm [shape: f32[128,128], index: 3, kind: input, shape index: {}]   ;;  %s757_s4 = inlined_call_operand.vmem [shape: f32[1,128], index: 4, kind: input, shape index: {}]   ;;  %s758_s5 = inlined_call_operand.hbm [shape: f32[16,128], index: 5, kind: output, shape index: {}]  }
   0x1   :  { %11 = vsyncpa [#allocation4], 0  ;;  %s674_s18 = smov [#allocation2]   ;;  %s626_s22 = scalar_lea.hbm %s756_s3, 2048 }
   0x2   :  { %s23_s19 = sshll.u32 %s674_s18, 4  ;;  %p627_p0 = scmp.ne.s32.totalorder %s756_s3, %s626_s22  ;;  %s24_s19 = int_to_ptr.vmem [resolvable:$true] %s23_s19 }
   0x3   :  { %p630_p1 = scmp.lt.u32.totalorder %s626_s22, %s756_s3 }
   0x5   :  { %p632_p2 = pnand %p630_p1, %p627_p0 }
   0x7   :  { %635 = shalt.err (!%p632_p2)
}
   0x8   :  { %s636_s27 = scalar_lea.vmem %s24_s19, 2048  ;;  %p641_p4 = scmp.lt.s32.totalorder %s24_s19, %s24_s19 }
   0x9   :  { %p637_p3 = scmp.ne.s32.totalorder %s24_s19, %s636_s27  ;;  %p642_p5 = scmp.lt.s32.totalorder %s636_s27, %s636_s27 }
   0xb   :  { %p643_p6 = por %p642_p5, %p641_p4 }
   0xd   :  { %p644_p7 = pnand %p643_p6, %p637_p3 }
   0xf   :  { %647 = shalt.err (!%p644_p7)
}
  0x10   :  { %s675_s28 = smov 128   ;;  %s676_s29 = smov 8  }
  0x11   :  { %29 = dma.hbm_to_vmem [thread:$0]  %s756_s3, 2048, %s24_s19, [#allocation3], %s675_s28, %s675_s28, %s676_s29  }
  0x12   :  { %670 = dma.done.wait [#allocation3], 2048  }
  0x13   :  { %671 = vsyncadd [#allocation3], 4294965248  ;;  %vm52_vm0 = vcmask 1044480   ;;  %vm45_vm1 = vcmask 39936   ;;  %v37_v0 = vld [vmem:[%s754_s1] sm:$0x1f] }
  0x14   :  { %v35_v1 = vld [vmem:[%s753_s0] sm:$0xff]  ;;  %v36_v2 = vld [vmem:[%s753_s0 + $0x8] sm:$0xff]  ;;  %459 = vmatprep.subr.msk.mxu0 %vm52_vm0, %v37_v0  ;;  %v161_v6 = vld [vmem:[#allocation2 + $0x10] sm:$0xff] }
  0x15   :  { %461 = vmatprep.mubr.msk.f32.mxu0 %vm45_vm1, %v35_v1  ;;  %460 = vmatpush3.msk.msra.mxu0 %vm52_vm0, %v37_v0  ;;  %v159_v3 = vld [vmem:[#allocation2] sm:$0xff]  ;;  %v160_v4 = vld [vmem:[#allocation2 + $0x8] sm:$0xff]  ;;  %v162_v7 = vld [vmem:[#allocation2 + $0x18] sm:$0xff] }
  0x16   :  { %462 = vmatmul.mubr.msk.f32.vlgmr.msra.gmra.mrb[0].mxu0 %vm45_vm1, %v36_v2  ;;  %v534_v5 = vpack.c.bf16 %v160_v4, %v159_v3  ;;  %v538_v8 = vpack.c.bf16 %v162_v7, %v161_v6  ;;  %v163_v9 = vld [vmem:[#allocation2 + $0x20] sm:$0xff]  ;;  %v164_v10 = vld [vmem:[#allocation2 + $0x28] sm:$0xff]  ;;  %v165_v12 = vld [vmem:[#allocation2 + $0x30] sm:$0xff] }
  0x17   :  { %v542_v11 = vpack.c.bf16 %v164_v10, %v163_v9  ;;  %v166_v13 = vld [vmem:[#allocation2 + $0x38] sm:$0xff]  ;;  %v167_v15 = vld [vmem:[#allocation2 + $0x40] sm:$0xff]  ;;  %v168_v16 = vld [vmem:[#allocation2 + $0x48] sm:$0xff] }
  0x18   :  { %535 = vmatprep.subr.bf16.mxu1 %v534_v5  ;;  %567 = vmatprep.subr.bf16.mxu0 %v534_v5  ;;  %v546_v14 = vpack.c.bf16 %v166_v13, %v165_v12  ;;  %v550_v17 = vpack.c.bf16 %v168_v16, %v167_v15  ;;  %v169_v18 = vld [vmem:[#allocation2 + $0x50] sm:$0xff]  ;;  %v170_v19 = vld [vmem:[#allocation2 + $0x58] sm:$0xff]  ;;  %v171_v21 = vld [vmem:[#allocation2 + $0x60] sm:$0xff] }
  0x19   :  { %537 = vmatpush3.bf16.msra.mxu1 %v534_v5  ;;  %569 = vmatpush3.bf16.msra.mxu0 %v534_v5  ;;  %v554_v20 = vpack.c.bf16 %v170_v19, %v169_v18  ;;  %v172_v22 = vld [vmem:[#allocation2 + $0x68] sm:$0xff]  ;;  %v173_v24 = vld [vmem:[#allocation2 + $0x70] sm:$0xff]  ;;  %v174_v25 = vld [vmem:[#allocation2 + $0x78] sm:$0xff] }
  0x1a   :  { %539 = vmatprep.subr.bf16.mxu1 %v538_v8  ;;  %571 = vmatprep.subr.bf16.mxu0 %v538_v8  ;;  %v558_v23 = vpack.c.bf16 %v172_v22, %v171_v21  ;;  %v562_v26 = vpack.c.bf16 %v174_v25, %v173_v24  ;;  %v415_v27 = vld [vmem:[%s755_s2] ss:$0 sm:$0xff] }
  0x1b   :  { %v419_v58 = vld [vmem:[%s757_s4] ss:$0 sm:$0xff]  ;;  %s677_s4 = smov [#allocation5]  }
  0x1c   :  { %s403_s13 = sshll.u32 %s677_s4, 4  ;;  %s404_s13 = int_to_ptr.vmem [resolvable:$true] %s403_s13 }
  0x1d   :  { %541 = vmatpush3.bf16.msra.mxu1 %v538_v8  ;;  %573 = vmatpush3.bf16.msra.mxu0 %v538_v8  ;;  %s648_s14 = scalar_lea.vmem %s404_s13, 256  ;;  %p653_p9 = scmp.lt.s32.totalorder %s404_s13, %s404_s13 }
  0x1e   :  { %543 = vmatprep.subr.bf16.mxu1 %v542_v11  ;;  %575 = vmatprep.subr.bf16.mxu0 %v542_v11  ;;  %p649_p8 = scmp.ne.s32.totalorder %s404_s13, %s648_s14  ;;  %p654_p10 = scmp.lt.s32.totalorder %s648_s14, %s648_s14 }
  0x20   :  { %p655_p11 = por %p654_p10, %p653_p9 }
  0x21   :  { %545 = vmatpush3.bf16.msra.mxu1 %v542_v11  ;;  %577 = vmatpush3.bf16.msra.mxu0 %v542_v11 }
  0x22   :  { %547 = vmatprep.subr.bf16.mxu1 %v546_v14  ;;  %579 = vmatprep.subr.bf16.mxu0 %v546_v14  ;;  %p656_p12 = pnand %p655_p11, %p649_p8 }
  0x25   :  { %549 = vmatpush3.bf16.msra.mxu1 %v546_v14  ;;  %581 = vmatpush3.bf16.msra.mxu0 %v546_v14 }
  0x26   :  { %551 = vmatprep.subr.bf16.mxu1 %v550_v17  ;;  %583 = vmatprep.subr.bf16.mxu0 %v550_v17 }
  0x29   :  { %553 = vmatpush3.bf16.msra.mxu1 %v550_v17  ;;  %585 = vmatpush3.bf16.msra.mxu0 %v550_v17 }
  0x2a   :  { %555 = vmatprep.subr.bf16.mxu1 %v554_v20  ;;  %587 = vmatprep.subr.bf16.mxu0 %v554_v20 }
  0x2d   :  { %557 = vmatpush3.bf16.msra.mxu1 %v554_v20  ;;  %589 = vmatpush3.bf16.msra.mxu0 %v554_v20 }
  0x2e   :  { %559 = vmatprep.subr.bf16.mxu1 %v558_v23  ;;  %591 = vmatprep.subr.bf16.mxu0 %v558_v23 }
  0x31   :  { %561 = vmatpush3.bf16.msra.mxu1 %v558_v23  ;;  %593 = vmatpush3.bf16.msra.mxu0 %v558_v23 }
  0x32   :  { %563 = vmatprep.subr.bf16.mxu1 %v562_v26  ;;  %595 = vmatprep.subr.bf16.mxu0 %v562_v26 }
  0x35   :  { %565 = vmatpush3.bf16.msra.mxu1 %v562_v26  ;;  %597 = vmatpush3.bf16.msra.mxu0 %v562_v26 }
  0xe9   :  { %v463_v28 = vpop.f32.mrb[0].mxu0 }
  0xea   :  { %v128_v29 = vadd.f32 %v463_v28, %v415_v27  ;;  %v122_v30 = vpop.f32.mrb[1].mxu0 }
  0xeb   :  { %v123_v31 = vadd.f32 %v415_v27, %v122_v30 }
  0xec   :  { %v132_v32 = vand.u32 2147483647, %v128_v29 }
  0xed   :  { %v131_v33 = vand.u32 2147483647, %v123_v31 }
  0xee   :  { %v134_v34 = vmul.f32 -2.0, %v132_v32 }
  0xef   :  { %v133_v35 = vmul.f32 -2.0, %v131_v33 }
  0xf0   :  { %v137_v36 = vmul.f32 1.442695, %v134_v34 }
  0xf1   :  { %v135_v37 = vmul.f32 1.442695, %v133_v35 }
  0xf2   :  { %602 = vpow2.f32 %v137_v36 }
  0xf3   :  { %604 = vpow2.f32 %v135_v37 }
  0xfc   :  { %v603_v38 = vpop.eup %602 }
  0xfd   :  { %v605_v39 = vpop.eup %604  ;;  %v148_v40 = vadd.f32 1.0, %v603_v38  ;;  %v151_v42 = vmul.f32 -0.5, %v603_v38  ;;  %v154_v45 = vand.u32 2147483647, %v603_v38 }
  0xfe   :  { %v139_v41 = vadd.f32 1.0, %v605_v39  ;;  %v142_v43 = vmul.f32 -0.5, %v605_v39  ;;  %v145_v47 = vand.u32 2147483647, %v605_v39 }
  0xff   :  { %606 = vlog2.f32 %v148_v40  ;;  %v152_v44 = vadd.f32 1.0, %v151_v42  ;;  %vm155_vm2 = vcmp.lt.f32.partialorder %v154_v45, 0.0004427343 }
 0x100   :  { %608 = vlog2.f32 %v139_v41  ;;  %v143_v46 = vadd.f32 1.0, %v142_v43  ;;  %vm146_vm3 = vcmp.lt.f32.partialorder %v145_v47, 0.0004427343 }
 0x101   :  { %v153_v51 = vmul.f32 %v603_v38, %v152_v44 }
 0x102   :  { %v144_v53 = vmul.f32 %v605_v39, %v143_v46 }
 0x109   :  { %v607_v48 = vpop.eup %606 }
 0x10a   :  { %v609_v49 = vpop.eup %608  ;;  %v150_v50 = vmul.f32 0.6931472, %v607_v48 }
 0x10b   :  { %v141_v52 = vmul.f32 0.6931472, %v609_v49 }
 0x10c   :  { %v156_v54 = vsel %vm155_vm2, %v153_v51, %v150_v50 }
 0x10d   :  { %v147_v55 = vsel %vm146_vm3, %v144_v53, %v141_v52  ;;  %v158_v57 = vadd.f32 %v156_v54, %v132_v32 }
 0x10e   :  { %v157_v56 = vadd.f32 %v147_v55, %v131_v33 }
 0x110   :  { %496 = vmatprep.mubr.f32.mxu1 %v157_v56 }
 0x111   :  { %497 = vmatmul.mubr.f32.vlgmr.msra.gmra.mrb[0].mxu1 %v158_v57 }
 0x1e4   :  { %v498_v59 = vpop.f32.mrb[0].mxu1 }
 0x1e5   :  { %v254_v60 = vadd.f32 %v498_v59, %v419_v58  ;;  %v248_v61 = vpop.f32.mrb[1].mxu1 }
 0x1e6   :  { %v249_v62 = vadd.f32 %v419_v58, %v248_v61 }
 0x1e7   :  { %v258_v63 = vand.u32 2147483647, %v254_v60 }
 0x1e8   :  { %v257_v0 = vand.u32 2147483647, %v249_v62 }
 0x1e9   :  { %v260_v1 = vmul.f32 -2.0, %v258_v63 }
 0x1ea   :  { %v259_v2 = vmul.f32 -2.0, %v257_v0 }
 0x1eb   :  { %v263_v3 = vmul.f32 1.442695, %v260_v1 }
 0x1ec   :  { %v261_v4 = vmul.f32 1.442695, %v259_v2 }
 0x1ed   :  { %610 = vpow2.f32 %v263_v3 }
 0x1ee   :  { %612 = vpow2.f32 %v261_v4 }
 0x1f7   :  { %v611_v5 = vpop.eup %610 }
 0x1f8   :  { %v613_v6 = vpop.eup %612  ;;  %v274_v7 = vadd.f32 1.0, %v611_v5  ;;  %v277_v9 = vmul.f32 -0.5, %v611_v5  ;;  %v280_v12 = vand.u32 2147483647, %v611_v5 }
 0x1f9   :  { %v265_v8 = vadd.f32 1.0, %v613_v6  ;;  %v268_v10 = vmul.f32 -0.5, %v613_v6  ;;  %v271_v14 = vand.u32 2147483647, %v613_v6 }
 0x1fa   :  { %614 = vlog2.f32 %v274_v7  ;;  %v278_v11 = vadd.f32 1.0, %v277_v9  ;;  %vm281_vm4 = vcmp.lt.f32.partialorder %v280_v12, 0.0004427343 }
 0x1fb   :  { %616 = vlog2.f32 %v265_v8  ;;  %v269_v13 = vadd.f32 1.0, %v268_v10  ;;  %vm272_vm5 = vcmp.lt.f32.partialorder %v271_v14, 0.0004427343 }
 0x1fc   :  { %v279_v18 = vmul.f32 %v611_v5, %v278_v11 }
 0x1fd   :  { %v270_v20 = vmul.f32 %v613_v6, %v269_v13 }
 0x204   :  { %v615_v15 = vpop.eup %614 }
 0x205   :  { %v617_v16 = vpop.eup %616  ;;  %v276_v17 = vmul.f32 0.6931472, %v615_v15 }
 0x206   :  { %v267_v19 = vmul.f32 0.6931472, %v617_v16 }
 0x207   :  { %v282_v21 = vsel %vm281_vm4, %v279_v18, %v276_v17 }
 0x208   :  { %v284_v22 = vadd.f32 %v282_v21, %v258_v63  ;;  %v273_v23 = vsel %vm272_vm5, %v270_v20, %v267_v19 }
 0x209   :  { %v283_v24 = vadd.f32 %v273_v23, %v257_v0 }
 0x20a   :  { %v286_v25 = vmul.f32 0.5, %v284_v22 }
 0x20b   :  { %v285_v26 = vmul.f32 0.5, %v283_v24 }
 0x20c   :  { %v288_v28 = vadd.f32 %v286_v25, %v158_v57 }
 0x20d   :  { %v287_v27 = vadd.f32 %v285_v26, %v157_v56 }
 0x20f   :  { %531 = vmatprep.mubr.f32.mxu0 %v287_v27 }
 0x210   :  { %532 = vmatmul.mubr.f32.vlgmr.msra.gmra.mrb[2].mxu0 %v288_v28 }
 0x2e3   :  { %v533_v29 = vpop.f32.mrb[2].mxu0 }
 0x2e4   :  { %v361_v30 = vadd.f32 %v533_v29, %v419_v58  ;;  %v355_v31 = vpop.f32.mrb[3].mxu0 }
 0x2e5   :  { %v356_v32 = vadd.f32 %v419_v58, %v355_v31 }
 0x2e6   :  { %v365_v33 = vand.u32 2147483647, %v361_v30 }
 0x2e7   :  { %v364_v34 = vand.u32 2147483647, %v356_v32 }
 0x2e8   :  { %v367_v35 = vmul.f32 -2.0, %v365_v33 }
 0x2e9   :  { %v366_v36 = vmul.f32 -2.0, %v364_v34 }
 0x2ea   :  { %v370_v37 = vmul.f32 1.442695, %v367_v35 }
 0x2eb   :  { %v368_v38 = vmul.f32 1.442695, %v366_v36 }
 0x2ec   :  { %618 = vpow2.f32 %v370_v37 }
 0x2ed   :  { %620 = vpow2.f32 %v368_v38 }
 0x2f6   :  { %v619_v39 = vpop.eup %618 }
 0x2f7   :  { %v621_v40 = vpop.eup %620  ;;  %v381_v41 = vadd.f32 1.0, %v619_v39  ;;  %v384_v43 = vmul.f32 -0.5, %v619_v39  ;;  %v387_v46 = vand.u32 2147483647, %v619_v39 }
 0x2f8   :  { %v372_v42 = vadd.f32 1.0, %v621_v40  ;;  %v375_v44 = vmul.f32 -0.5, %v621_v40  ;;  %v378_v48 = vand.u32 2147483647, %v621_v40 }
 0x2f9   :  { %622 = vlog2.f32 %v381_v41  ;;  %v385_v45 = vadd.f32 1.0, %v384_v43  ;;  %vm388_vm6 = vcmp.lt.f32.partialorder %v387_v46, 0.0004427343 }
 0x2fa   :  { %624 = vlog2.f32 %v372_v42  ;;  %v376_v47 = vadd.f32 1.0, %v375_v44  ;;  %vm379_vm7 = vcmp.lt.f32.partialorder %v378_v48, 0.0004427343 }
 0x2fb   :  { %v386_v52 = vmul.f32 %v619_v39, %v385_v45 }
 0x2fc   :  { %v377_v54 = vmul.f32 %v621_v40, %v376_v47 }
 0x303   :  { %v623_v49 = vpop.eup %622 }
 0x304   :  { %v625_v50 = vpop.eup %624  ;;  %v383_v51 = vmul.f32 0.6931472, %v623_v49 }
 0x305   :  { %v374_v53 = vmul.f32 0.6931472, %v625_v50 }
 0x306   :  { %v389_v55 = vsel %vm388_vm6, %v386_v52, %v383_v51 }
 0x307   :  { %v391_v56 = vadd.f32 %v389_v55, %v365_v33  ;;  %v380_v57 = vsel %vm379_vm7, %v377_v54, %v374_v53 }
 0x308   :  { %v390_v58 = vadd.f32 %v380_v57, %v364_v34 }
 0x309   :  { %v393_v59 = vmul.f32 0.5, %v391_v56 }
 0x30a   :  { %v392_v60 = vmul.f32 0.5, %v390_v58 }
 0x30b   :  { %v395_v61 = vadd.f32 %v393_v59, %v288_v28 }
 0x30c   :  { %v394_v62 = vadd.f32 %v392_v60, %v287_v27 }
 0x30d   :  { %397 = vst [vmem:[#allocation5 + $0x8] sm:$0xff] %v395_v61 }
 0x30e   :  { %396 = vst [vmem:[#allocation5] sm:$0xff] %v394_v62 }
 0x30f   :  { %659 = shalt.err (!%p656_p12)
}
 0x310   :  { %s660_s17 = scalar_lea.hbm %s758_s5, 256 }
 0x311   :  { %p661_p13 = scmp.ne.s32.totalorder %s758_s5, %s660_s17  ;;  %p664_p0 = scmp.lt.u32.totalorder %s660_s17, %s758_s5 }
 0x313   :  { %p666_p1 = pnand %p664_p0, %p661_p13 }
 0x315   :  { %669 = shalt.err (!%p666_p1)
}
 0x316   :  { %409 = dma.vmem_to_hbm [thread:$0]  %s404_s13, 256, %s758_s5, [#allocation4], %s675_s28, %s675_s28, %s676_s29  }
 0x317   :  { %672 = dma.done.wait [#allocation4], 256  }
 0x318   :  { %673 = vsyncadd [#allocation4], 4294967040 }
 0x319   :  { %413 = vsyncpa [#allocation3], 1 }
 0x31a   :  { %414 = vsyncpa [#allocation4], 1 }

</bundles_post_ra>
